<compile_context>
chip_gen: v7x
topology: tpu7x:2x2x1
jax: 0.10.0
libtpu: 0.0.40
codegen_flags: <defaults>
</compile_context>

<pallas_src>
import jax
import jax.numpy as jnp
from jax import lax
from jax.experimental import pallas as pl
from jax.experimental.pallas import tpu as pltpu


def _round_up(x, m):
    return ((x + m - 1) // m) * m


def _face_matmul_l2_kernel(x_ref, w_ref, b_ref, o_ref, acc_ref):
    # x_ref: [tm, tk] bf16    w_ref: [tk, E_pad] bf16    b_ref: [1, E_pad] f32
    # o_ref: [tm, E_pad] f32  acc_ref: [tm, E_pad] f32 (resident across K)
    k = pl.program_id(1)

    @pl.when(k == 0)
    def _init():
        acc_ref[...] = jnp.zeros_like(acc_ref)

    acc_ref[...] += jnp.dot(x_ref[...], w_ref[...],
                            preferred_element_type=jnp.float32)

    @pl.when(k == pl.num_programs(1) - 1)
    def _epilogue():
        y = acc_ref[...] + b_ref[...]                   # f32 bias add
        sq = jnp.sum(y * y, axis=1, keepdims=True)      # padded lanes are 0
        o_ref[...] = (y * lax.rsqrt(sq + 1e-5)).astype(o_ref.dtype)


def face_model_forward(x, w, b, *, channel="rgb", iters=1):
    """Reproduces FaceModel.forward(x, use_prelogits=False) semantics."""
    B = x.shape[0]

    # transform='None' -> identity transform. All `iters` concatenated copies
    # are bit-identical, so view(iter, B, -1).mean(0) == single-copy logits:
    # compute once instead of duplicating HBM traffic and MXU work.
    if channel == "bgr":
        x = jnp.flip(x, axis=1)

    x_flat = x.reshape(B, -1)
    D = x_flat.shape[1]
    E = w.shape[1]

    # ---- tile / padding choices (MXU-, lane-, sublane-aligned) -------------
    tm = min(128, _round_up(B, 16))          # sublane-friendly M tile (bf16)
    tk = min(512, _round_up(D, 128))         # K reduction tile
    M_pad = _round_up(B, tm)
    D_pad = _round_up(D, tk)
    E_pad = _round_up(E, 128)                # lane-dense output, full-E N tile

    # bf16 operands for the MXU; zero padding keeps the L2 sum exact
    # (padded W columns and bias entries are zero -> padded y lanes are zero).
    x_p = jnp.zeros((M_pad, D_pad), jnp.bfloat16).at[:B, :D].set(
        x_flat.astype(jnp.bfloat16))
    w_p = jnp.zeros((D_pad, E_pad), jnp.bfloat16).at[:D, :E].set(
        w.astype(jnp.bfloat16))
    b_p = jnp.zeros((1, E_pad), jnp.float32).at[0, :E].set(
        b.reshape(-1).astype(jnp.float32))

    grid = (M_pad // tm, D_pad // tk)        # K innermost (accumulator resident)

    out = pl.pallas_call(
        _face_matmul_l2_kernel,
        out_shape=jax.ShapeDtypeStruct((M_pad, E_pad), jnp.float32),
        grid_spec=pltpu.PrefetchScalarGridSpec(
            num_scalar_prefetch=0,
            grid=grid,
            in_specs=[
                pl.BlockSpec((tm, tk), lambda i, k: (i, k)),      # X tile
                pl.BlockSpec((tk, E_pad), lambda i, k: (k, 0)),   # W tile
                pl.BlockSpec((1, E_pad), lambda i, k: (0, 0)),    # bias
            ],
            out_specs=pl.BlockSpec((tm, E_pad), lambda i, k: (i, 0)),
            scratch_shapes=[pltpu.VMEM((tm, E_pad), jnp.float32)],
        ),
        compiler_params=pltpu.CompilerParams(
            dimension_semantics=("parallel", "arbitrary")),
    )(x_p, w_p, b_p)

    # Discard padded rows/lanes. The PyTorch double-view + mean over iter is a
    # no-op here (identity transform, see short-circuit above).
    return out[:B, :E]


if __name__ == "__main__":
    key = jax.random.PRNGKey(0)
    kx, kw, kb = jax.random.split(key, 3)

    B, C, H, W = 2, 3, 16, 16            # small face-image batch, NCHW
    E = 32                               # small embedding_size
    D = C * H * W

    x = jax.random.normal(kx, (B, C, H, W), dtype=jnp.float32)
    w = jax.random.normal(kw, (D, E), dtype=jnp.float32) * 0.02
    b = jax.random.normal(kb, (E,), dtype=jnp.float32) * 0.01

    out = face_model_forward(x, w, b, channel="rgb", iters=1)
    out = jax.block_until_ready(out)

    # sanity: shape, agreement with f32 reference, unit L2 norm
    assert out.shape == (B, E)
    y_ref = x.reshape(B, -1) @ w + b
    ref = y_ref / jnp.sqrt(jnp.sum(y_ref ** 2, axis=1, keepdims=True) + 1e-5)
    assert float(jnp.max(jnp.abs(out - ref))) < 5e-2
    norms = jnp.sqrt(jnp.sum(out * out, axis=1))
    assert bool(jnp.all(jnp.abs(norms - 1.0) < 1e-2))

    print("KERNEL_OK")
</pallas_src>

<mosaic_0001>
module attributes {stable_mosaic.version = 11 : i64} {
  func.func @_face_matmul_l2_kernel(%arg0: i32, %arg1: i32, %arg2: memref<16x512xbf16, #tpu.memory_space<vmem>>, %arg3: memref<512x128xbf16, #tpu.memory_space<vmem>>, %arg4: memref<1x128xf32, #tpu.memory_space<vmem>>, %arg5: memref<16x128xf32, #tpu.memory_space<vmem>>, %arg6: memref<16x128xf32, #tpu.memory_space<vmem>>) attributes {dimension_semantics = [#tpu.dimension_semantics<parallel>, #tpu.dimension_semantics<arbitrary>], iteration_bounds = array<i64: 1, 2>, scalar_prefetch = 0 : i64, scratch_operands = 1 : i64, tpu.core_type = #tpu.core_type<tc>, window_params = [{transform_indices = @transform_0, window_bounds = array<i64: 16, 512>}, {transform_indices = @transform_1, window_bounds = array<i64: 512, 128>}, {pipeline_mode = #tpu.pipeline_mode<synchronous>, transform_indices = @transform_2, window_bounds = array<i64: 1, 128>}, {transform_indices = @transform_3, window_bounds = array<i64: 16, 128>}]} {
    %c0_i32 = arith.constant 0 : i32
    %0 = arith.cmpi eq, %arg1, %c0_i32 : i32
    %1 = arith.extui %0 : i1 to i32
    %c0_i32_0 = arith.constant 0 : i32
    %2 = arith.cmpi ne, %1, %c0_i32_0 : i32
    scf.if %2 {
      %cst_9 = arith.constant 0.000000e+00 : f32
      %12 = vector.broadcast %cst_9 : f32 to vector<16x128xf32>
      %c0_10 = arith.constant 0 : index
      %c0_11 = arith.constant 0 : index
      %13 = vector.load %arg6[%c0_10, %c0_11] : memref<16x128xf32, #tpu.memory_space<vmem>>, vector<16x128xf32>
      tpu.vector_store %arg6[%c0_10, %c0_11], %12 {strides = array<i32>} : memref<16x128xf32, #tpu.memory_space<vmem>>, vector<16x128xf32>,
    } else {
    }
    %c0 = arith.constant 0 : index
    %c0_1 = arith.constant 0 : index
    %3 = vector.load %arg6[%c0, %c0_1] : memref<16x128xf32, #tpu.memory_space<vmem>>, vector<16x128xf32>
    %c0_2 = arith.constant 0 : index
    %c0_3 = arith.constant 0 : index
    %4 = vector.load %arg2[%c0_2, %c0_3] : memref<16x512xbf16, #tpu.memory_space<vmem>>, vector<16x512xbf16>
    %c0_4 = arith.constant 0 : index
    %c0_5 = arith.constant 0 : index
    %5 = vector.load %arg3[%c0_4, %c0_5] : memref<512x128xbf16, #tpu.memory_space<vmem>>, vector<512x128xbf16>
    %cst = arith.constant dense<0.000000e+00> : vector<16x128xf32>
    %6 = tpu.matmul %4, %5, %cst {dimension_numbers = #tpu.dot_dimension_numbers<[1], [0], [0], [1], [0, 0, 1, 1], [], []>} : vector<16x512xbf16>, vector<512x128xbf16>, vector<16x128xf32> -> vector<16x128xf32>
    %7 = arith.addf %3, %6 : vector<16x128xf32>
    %c0_6 = arith.constant 0 : index
    %c0_7 = arith.constant 0 : index
    %8 = vector.load %arg6[%c0_6, %c0_7] : memref<16x128xf32, #tpu.memory_space<vmem>>, vector<16x128xf32>
    tpu.vector_store %arg6[%c0_6, %c0_7], %7 {strides = array<i32>} : memref<16x128xf32, #tpu.memory_space<vmem>>, vector<16x128xf32>,
    %c1_i32 = arith.constant 1 : i32
    %9 = arith.cmpi eq, %arg1, %c1_i32 : i32
    %10 = arith.extui %9 : i1 to i32
    %c0_i32_8 = arith.constant 0 : i32
    %11 = arith.cmpi ne, %10, %c0_i32_8 : i32
    scf.if %11 {
      %c0_9 = arith.constant 0 : index
      %c0_10 = arith.constant 0 : index
      %12 = vector.load %arg6[%c0_9, %c0_10] : memref<16x128xf32, #tpu.memory_space<vmem>>, vector<16x128xf32>
      %c0_11 = arith.constant 0 : index
      %c0_12 = arith.constant 0 : index
      %13 = vector.load %arg4[%c0_11, %c0_12] : memref<1x128xf32, #tpu.memory_space<vmem>>, vector<1x128xf32>
      %14 = vector.broadcast %13 : vector<1x128xf32> to vector<16x128xf32>
      %15 = arith.addf %12, %14 : vector<16x128xf32>
      %16 = arith.mulf %15, %15 : vector<16x128xf32>
      %cst_13 = arith.constant dense<0.000000e+00> : vector<16xf32>
      %17 = vector.multi_reduction <add>, %16, %cst_13 [1] : vector<16x128xf32> to vector<16xf32>
      %18 = vector.shape_cast %17 : vector<16xf32> to vector<16x1xf32>
      %cst_14 = arith.constant 9.99999974E-6 : f32
      %19 = vector.broadcast %cst_14 : f32 to vector<16x1xf32>
      %20 = arith.addf %18, %19 : vector<16x1xf32>
      %21 = math.rsqrt %20 : vector<16x1xf32>
      %22 = vector.broadcast %21 : vector<16x1xf32> to vector<16x128xf32>
      %23 = arith.mulf %15, %22 : vector<16x128xf32>
      %c0_15 = arith.constant 0 : index
      %c0_16 = arith.constant 0 : index
      %24 = vector.load %arg5[%c0_15, %c0_16] : memref<16x128xf32, #tpu.memory_space<vmem>>, vector<16x128xf32>
      tpu.vector_store %arg5[%c0_15, %c0_16], %23 {strides = array<i32>} : memref<16x128xf32, #tpu.memory_space<vmem>>, vector<16x128xf32>,
    } else {
    }
    return
  }
  func.func @transform_0(%arg0: i32, %arg1: i32) -> (i32, i32) {
    %c0_i32 = arith.constant 0 : i32
    return %arg0, %arg1 : i32, i32
  }
  func.func @transform_1(%arg0: i32, %arg1: i32) -> (i32, i32) {
    %c0_i32 = arith.constant 0 : i32
    %c0_i32_0 = arith.constant 0 : i32
    return %arg1, %c0_i32 : i32, i32
  }
  func.func @transform_2(%arg0: i32, %arg1: i32) -> (i32, i32) {
    %c0_i32 = arith.constant 0 : i32
    %c0_i32_0 = arith.constant 0 : i32
    %c0_i32_1 = arith.constant 0 : i32
    return %c0_i32, %c0_i32_0 : i32, i32
  }
  func.func @transform_3(%arg0: i32, %arg1: i32) -> (i32, i32) {
    %c0_i32 = arith.constant 0 : i32
    %c0_i32_0 = arith.constant 0 : i32
    return %arg0, %c0_i32 : i32, i32
  }
}

</mosaic_0001>

<bundles_post_ra>
// kernel: tpu_custom_call.1
= control target key start
LH: loop header
LB: loop body
LE: loop exit
PB: predicated region body
PF: predicated region fallthrough
CT: control target
= control target key end

     0   :  { %8 = vsyncpa [#allocation4], 0  ;;  %s1385_s0 = inlined_call_operand.hbm [shape: bf16[16,1024], index: 0, kind: input, shape index: {}]   ;;  %s1386_s1 = inlined_call_operand.hbm [shape: bf16[1024,128], index: 1, kind: input, shape index: {}]   ;;  %s1387_s2 = inlined_call_operand.vmem [shape: f32[1,128], index: 2, kind: input, shape index: {}]   ;;  %s1388_s3 = inlined_call_operand.hbm [shape: f32[16,128], index: 3, kind: output, shape index: {}]  }
   0x1   :  { %10 = vsyncpa [#allocation4 + $0x1], 0 }
   0x2   :  { %11 = vsyncpa [#allocation7], 0 }
   0x3   :  { %13 = vsyncpa [#allocation7 + $0x1], 0 }
   0x4   :  { %14 = vsyncpa [#allocation5], 0  ;;  %s1141_s12 = smov 0   ;;  %s1143_s13 = smov 0  }
   0x5   :  { %s1145_s14 = smov 0   ;;  %s1147_s15 = smov 0  }
   0x6   :  { %s1149_s16 = smov 0   ;;  %s1151_s17 = smov 0  }
   0x7 LB: > { %s746_s18 = sadd.s32 4294967295, %s1108_s17   ;;  %s29_s19 = sadd.s32 1, %s1104_s16  ;;  %s1108_s17 = sphi %s1151_s17, %s20_s17   ;;  %s1104_s16 = sphi %s1149_s16, %s1401_s16   ;;  %s1100_s15 = sphi %s1147_s15, %s1400_s15   ;;  %s1096_s14 = sphi %s1145_s14, %s1399_s14   ;;  %s1092_s13 = sphi %s1143_s13, %s1398_s13   ;;  %s1088_s12 = sphi %s1141_s12, %s1397_s12  }
   0x8   : > { %p30_p0 = scmp.ge.s32.totalorder %s29_s19, 2  ;;  %s41_s20 = sadd.s32 1, %s1096_s14 }
   0x9   : > { %p48_p1 = scmp.ne.s32.totalorder %s1096_s14, %s1092_s13  ;;  %p49_p2 = scmp.eq.s32.totalorder %s1108_s17, 0 }
   0xa   : > { %s1403_s19 = smov (%p30_p0, %s29_s19), 0  ;;  %p54_p4 = scmp.ne.s32.totalorder %s1092_s13, %s1088_s12 }
   0xb   : > { %p1177_p3 = por %p49_p2, %p48_p1  ;;  %s37_s22 = ssub.s32 %s1104_s16, %s1403_s19 }
   0xc   : > { %p55_p5 = scmp.eq.s32.totalorder %s746_s18, 0  ;;  %p39_p6 = scmp.eq.s32.totalorder %s37_s22, 0 }
   0xd   : > { %p862_p8 = scmp.lt.s32.totalorder %s1108_s17, 2  ;;  %s1195_s25 = sand.u32 1, %s1096_s14  }
   0xe   : > { %p1186_p7 = por %p55_p5, %p54_p4  ;;  %s801_s26 = sshll.u32 %s1104_s16, 8 }
   0xf   : > { %s1192_s24 = scalar_select %p39_p6, %s1096_s14, %s41_s20  }
  0x10   : > { %s1391_s23 = scalar_select %p1186_p7, 1, 0 }
  0x11   : > { %s749_s27 = sshll.u32 %s1195_s25, 5  ;;  %s1202_s30 = scalar_lea.hbm %s1385_s0, %s801_s26 }
  0x12   : > { %s158_s4 = scalar_lea.vmem [#allocation3], %s749_s27  ;;  %p1206_p9 = pnand %p862_p8, %p1177_p3 }
  0x13   : > { %s168_s5 = sshll.u32 %s158_s4, 4  ;;  %s155_s7 = scalar_lea.sflag [#allocation4], %s1195_s25  ;;  %s1210_s5 = int_to_ptr.vmem [resolvable:$true] %s168_s5 }
  0x14   : > { %s964_s8 = scalar_lea.hbm %s1202_s30, 512  ;;  %p966_p12 = pneg %p1206_p9 }
  0x15   : > { %p965_p11 = scmp.ne.s32.totalorder %s1202_s30, %s964_s8  ;;  %s969_s11 = scalar_lea.hbm %s1385_s0, 1024 }
  0x16   : > { %p970_p1 = scmp.lt.u32.totalorder %s1202_s30, %s1385_s0  ;;  %p971_p2 = scmp.lt.u32.totalorder %s969_s11, %s964_s8 }
  0x17   : > { %p967_p13 = pnand %p966_p12, %p965_p11  ;;  %p973_p4 = scmp.lt.u32.totalorder %s964_s8, %s1202_s30 }
  0x18   : > { %p972_p3 = por %p971_p2, %p970_p1 }
  0x19   : > { %p968_p0 = pneg %p967_p13 }
  0x1a   : > { %p974_p5 = por %p973_p4, %p972_p3 }
  0x1c   : > { %p975_p6 = pnand %p974_p5, %p968_p0 }
  0x1e   : > { %978 = shalt.err (!%p975_p6)
}
  0x1f   : > { %s979_s21 = scalar_lea.vmem %s1210_s5, 512  ;;  %s1110_s22 = smov [#allocation3]  }
  0x20   : > { %p980_p8 = scmp.ne.s32.totalorder %s1210_s5, %s979_s21  ;;  %s984_s26 = sshll.u32 %s1110_s22, 4  ;;  %s985_s26 = int_to_ptr.vmem [resolvable:$false] %s984_s26 }
  0x21   : > { %s986_s27 = scalar_lea.vmem %s985_s26, 1024  ;;  %p987_p10 = scmp.lt.s32.totalorder %s1210_s5, %s985_s26 }
  0x22   : > { %p982_p11 = pnand %p980_p8, %p966_p12  ;;  %p988_p1 = scmp.lt.s32.totalorder %s986_s27, %s979_s21 }
  0x24   : > { %p983_p13 = pneg %p982_p11  ;;  %p989_p2 = por %p988_p1, %p987_p10 }
  0x26   : > { %p990_p3 = pnand %p989_p2, %p983_p13 }
  0x28   : > { %993 = shalt.err (!%p990_p3)
}
  0x29   : > { %s1111_s28 = smov 512   ;;  %s1112_s29 = smov 256  }
  0x2a   : > { %s1113_s4 = smov 16   ;;  %p197_p0 = scmp.lt.s32.totalorder %s1108_s17, 3 }
  0x2b   : > { %858 = dma.hbm_to_vmem [thread:$0]  (!%p1206_p9), %s1202_s30, 512, %s1210_s5, %s155_s7, %s1111_s28, %s1112_s29, %s1113_s4  }
  0x2c   : > { %s752_s8 = sshll.u32 %s1195_s25, 8  ;;  %s802_s9 = sshll.u32 %s1104_s16, 12 }
  0x2d   : > { %p1393_p10 = scmp.ge.s32.totalorder %s1108_s17, 1  ;;  %s1253_s20 = scalar_lea.hbm %s1386_s1, %s802_s9 }
  0x2e   : > { %s182_s21 = scalar_lea.vmem [#allocation6], %s752_s8  ;;  %s179_s30 = scalar_lea.sflag [#allocation7], %s1195_s25 }
  0x2f   : > { %p1246_p4 = pnand %p1393_p10, %p197_p0  ;;  %s189_s22 = sshll.u32 %s182_s21, 4  ;;  %s1255_s22 = int_to_ptr.vmem [resolvable:$true] %s189_s22 }
  0x30   : > { %s994_s5 = scalar_lea.hbm %s1253_s20, 4096  ;;  %s999_s27 = scalar_lea.hbm %s1386_s1, 8192 }
  0x31   : > { %p995_p5 = scmp.ne.s32.totalorder %s1253_s20, %s994_s5  ;;  %p1000_p11 = scmp.lt.u32.totalorder %s1253_s20, %s1386_s1 }
  0x32   : > { %p1001_p13 = scmp.lt.u32.totalorder %s999_s27, %s994_s5  ;;  %p1003_p2 = scmp.lt.u32.totalorder %s994_s5, %s1253_s20 }
  0x33   : > { %p997_p6 = pnand %p995_p5, %p966_p12 }
  0x34   : > { %p1002_p1 = por %p1001_p13, %p1000_p11 }
  0x35   : > { %p998_p8 = pneg %p997_p6 }
  0x36   : > { %p1004_p3 = por %p1003_p2, %p1002_p1 }
  0x38   : > { %p1005_p0 = pnand %p1004_p3, %p998_p8 }
  0x3a   : > { %1008 = shalt.err (!%p1005_p0)
}
  0x3b   : > { %s1009_s4 = scalar_lea.vmem %s1255_s22, 4096  ;;  %s1114_s8 = smov [#allocation6]  }
  0x3c   : > { %p1010_p10 = scmp.ne.s32.totalorder %s1255_s22, %s1009_s4  ;;  %s1014_s9 = sshll.u32 %s1114_s8, 4  ;;  %s1015_s9 = int_to_ptr.vmem [resolvable:$false] %s1014_s9 }
  0x3d   : > { %s1016_s11 = scalar_lea.vmem %s1015_s9, 8192  ;;  %p1017_p7 = scmp.lt.s32.totalorder %s1255_s22, %s1015_s9 }
  0x3e   : > { %p1012_p5 = pnand %p1010_p10, %p966_p12  ;;  %p1018_p11 = scmp.lt.s32.totalorder %s1016_s11, %s1009_s4 }
  0x40   : > { %p1013_p6 = pneg %p1012_p5  ;;  %p1019_p13 = por %p1018_p11, %p1017_p7 }
  0x42   : > { %p1020_p1 = pnand %p1019_p13, %p1013_p6 }
  0x44   : > { %1023 = shalt.err (!%p1020_p1)
}
  0x45   : > { %s1115_s12 = smov 64   ;;  %s1116_s21 = smov 4  }
  0x46   : > { %861 = dma.hbm_to_vmem [thread:$0]  (!%p1206_p9), %s1253_s20, 4096, %s1255_s22, %s179_s30, %s1115_s12, %s1115_s12, %s1116_s21  }
  0x47   : > { %201 = sbr.rel (%p1246_p4) target bundleno = 545 (0x221), region = 32  ;;  %s203_s5 = sand.u32 (!%p1246_p4), 1, %s1092_s13  }
  0x48   : > { %s756_s7 = sshll.u32 (!%p1246_p4), %s203_s5, 5  ;;  %s204_s26 = scalar_lea.sflag (!%p1246_p4), [#allocation4], %s203_s5 }
  0x49   : > { %s1286_s27 = scalar_lea.vmem (!%p1246_p4), [#allocation3], %s756_s7  ;;  %p1395_p7 = scmp.ne.s32.totalorder (!%p1246_p4), %s1391_s23, 0 }
  0x4e   : > { %1075 = dma.done.wait (%p1395_p7), %s204_s26, 512  }
  0x4f   : > { %1077 = vsyncadd (%p1395_p7), %s204_s26, 4294966784  ;;  %s757_s28 = sshll.u32 %s203_s5, 8  ;;  %s213_s6 = scalar_lea.sflag [#allocation7], %s203_s5 }
  0x50   : > { %s1292_s25 = scalar_lea.vmem [#allocation6], %s757_s28 }
  0x51   : > { %1079 = dma.done.wait (%p1395_p7), %s213_s6, 4096  }
  0x52   : > { %1081 = vsyncadd (%p1395_p7), %s213_s6, 4294963200  ;;  %p758_p9 = scmp.ne.s32.totalorder %s1100_s15, 0 }
  0x53   : > { %v1117_v0 = vmov (!%p758_p9), 0.0  }
  0x54   : > { %247 = sbr.rel (%p758_p9) target bundleno = 91 (0x5b), region = 44  ;;  %248 = vst [vmem:[#allocation2] sm:$0xff] (!%p758_p9), %v1117_v0  ;;  %249 = vst [vmem:[#allocation2 + $0x8] sm:$0xff] (!%p758_p9), %v1117_v0 }
  0x5b PF: > { %v922_v1 = vld [vmem:[%s1292_s25 + $0x40] sm:$0xff]   ;;  %v926_v5 = vld [vmem:[%s1292_s25 + $0x48] sm:$0xff]   ;;  %v930_v9 = vld [vmem:[%s1292_s25 + $0x50] sm:$0xff]   ;;  %p795_p12 = scmp.ne.s32.totalorder %s1100_s15, 1 }
  0x5c   : > { %v923_v2 = vld [vmem:[%s1292_s25 + $0xc0] sm:$0xff]   ;;  %803 = vmatprep.subr.bf16.mxu0 %v922_v1  ;;  %v927_v6 = vld [vmem:[%s1292_s25 + $0xc8] sm:$0xff]   ;;  %v931_v10 = vld [vmem:[%s1292_s25 + $0xd0] sm:$0xff]  }
  0x5d   : > { %v924_v3 = vld [vmem:[%s1292_s25] sm:$0xff]   ;;  %825 = vmatprep.subr.bf16.mxu1 %v923_v2  ;;  %v928_v7 = vld [vmem:[%s1292_s25 + $0x8] sm:$0xff]   ;;  %v932_v11 = vld [vmem:[%s1292_s25 + $0x10] sm:$0xff]  }
  0x5e   : > { %v925_v4 = vld [vmem:[%s1292_s25 + $0x80] sm:$0xff]   ;;  %804 = vmatpush3.bf16.msra.mxu0 %v924_v3  ;;  %v929_v8 = vld [vmem:[%s1292_s25 + $0x88] sm:$0xff]   ;;  %v933_v12 = vld [vmem:[%s1292_s25 + $0x90] sm:$0xff]  }
  0x5f   : > { %826 = vmatpush3.bf16.msra.mxu1 %v925_v4  ;;  %805 = vmatprep.subr.bf16.mxu0 %v926_v5  ;;  %v934_v13 = vld [vmem:[%s1292_s25 + $0x58] sm:$0xff]   ;;  %v938_v17 = vld [vmem:[%s1292_s25 + $0x60] sm:$0xff]   ;;  %v942_v21 = vld [vmem:[%s1292_s25 + $0x68] sm:$0xff]  }
  0x60   : > { %827 = vmatprep.subr.bf16.mxu1 %v927_v6  ;;  %v935_v14 = vld [vmem:[%s1292_s25 + $0xd8] sm:$0xff]   ;;  %v939_v18 = vld [vmem:[%s1292_s25 + $0xe0] sm:$0xff]   ;;  %v943_v22 = vld [vmem:[%s1292_s25 + $0xe8] sm:$0xff]  }
  0x61   : > { %v936_v15 = vld [vmem:[%s1292_s25 + $0x18] sm:$0xff]   ;;  %v940_v19 = vld [vmem:[%s1292_s25 + $0x20] sm:$0xff]   ;;  %v944_v23 = vld [vmem:[%s1292_s25 + $0x28] sm:$0xff]  }
  0x62   : > { %806 = vmatpush3.bf16.msra.mxu0 %v928_v7  ;;  %v937_v16 = vld [vmem:[%s1292_s25 + $0x98] sm:$0xff]   ;;  %v941_v20 = vld [vmem:[%s1292_s25 + $0xa0] sm:$0xff]   ;;  %v945_v24 = vld [vmem:[%s1292_s25 + $0xa8] sm:$0xff]  }
  0x63   : > { %828 = vmatpush3.bf16.msra.mxu1 %v929_v8  ;;  %807 = vmatprep.subr.bf16.mxu0 %v930_v9  ;;  %v946_v25 = vld [vmem:[%s1292_s25 + $0x70] sm:$0xff]   ;;  %v950_v29 = vld [vmem:[%s1292_s25 + $0x78] sm:$0xff]  }
  0x64   : > { %829 = vmatprep.subr.bf16.mxu1 %v931_v10  ;;  %v947_v26 = vld [vmem:[%s1292_s25 + $0xf0] sm:$0xff]   ;;  %v951_v30 = vld [vmem:[%s1292_s25 + $0xf8] sm:$0xff]  }
  0x65   : > { %v948_v27 = vld [vmem:[%s1292_s25 + $0x30] sm:$0xff]   ;;  %v952_v31 = vld [vmem:[%s1292_s25 + $0x38] sm:$0xff]  }
  0x66   : > { %808 = vmatpush3.bf16.msra.mxu0 %v932_v11  ;;  %v949_v28 = vld [vmem:[%s1292_s25 + $0xb0] sm:$0xff]   ;;  %v953_v32 = vld [vmem:[%s1292_s25 + $0xb8] sm:$0xff]  }
  0x67   : > { %830 = vmatpush3.bf16.msra.mxu1 %v933_v12  ;;  %809 = vmatprep.subr.bf16.mxu0 %v934_v13  ;;  %v954_v33 = vld [vmem:[%s1286_s27] ss:$16 sps:$4 sm:$0xff]   ;;  %v956_v34 = vld [vmem:[%s1286_s27 + $0x4] ss:$16 sps:$4 sm:$0xff]   ;;  %v957_v35 = vld [vmem:[%s1286_s27 + $0x8] ss:$16 sps:$4 sm:$0xff]  }
  0x68   : > { %831 = vmatprep.subr.bf16.mxu1 %v935_v14  ;;  %v959_v36 = vld [vmem:[%s1286_s27 + $0xc] ss:$16 sps:$4 sm:$0xff]   ;;  %564 = vmatprep.mubr.bf16.mxu0 %v956_v34  ;;  %v250_v46 = vld [vmem:[#allocation2] sm:$0xff] }
  0x69   : > { %605 = vmatprep.mubr.bf16.mxu1 %v959_v36  ;;  %v251_v51 = vld [vmem:[#allocation2 + $0x8] sm:$0xff]  ;;  %v796_v56 = vld [vmem:[%s1387_s2] ss:$0 sm:$0xff] (!%p795_p12) }
  0x6a   : > { %810 = vmatpush3.bf16.msra.mxu0 %v936_v15 }
  0x6b   : > { %832 = vmatpush3.bf16.msra.mxu1 %v937_v16  ;;  %811 = vmatprep.subr.bf16.mxu0 %v938_v17 }
  0x6c   : > { %833 = vmatprep.subr.bf16.mxu1 %v939_v18 }
  0x6e   : > { %812 = vmatpush3.bf16.msra.mxu0 %v940_v19 }
  0x6f   : > { %834 = vmatpush3.bf16.msra.mxu1 %v941_v20  ;;  %813 = vmatprep.subr.bf16.mxu0 %v942_v21 }
  0x70   : > { %835 = vmatprep.subr.bf16.mxu1 %v943_v22 }
  0x72   : > { %814 = vmatpush3.bf16.msra.mxu0 %v944_v23 }
  0x73   : > { %836 = vmatpush3.bf16.msra.mxu1 %v945_v24  ;;  %815 = vmatprep.subr.bf16.mxu0 %v946_v25 }
  0x74   : > { %837 = vmatprep.subr.bf16.mxu1 %v947_v26 }
  0x76   : > { %816 = vmatpush3.bf16.msra.mxu0 %v948_v27 }
  0x77   : > { %838 = vmatpush3.bf16.msra.mxu1 %v949_v28  ;;  %817 = vmatprep.subr.bf16.mxu0 %v950_v29 }
  0x78   : > { %839 = vmatprep.subr.bf16.mxu1 %v951_v30 }
  0x7a   : > { %818 = vmatpush3.bf16.msra.mxu0 %v952_v31 }
  0x7b   : > { %840 = vmatpush3.bf16.msra.mxu1 %v953_v32 }
  0x7d   : > { %565 = vmatmul.mubr.bf16.vlgmr.msra.gmra.mrb[0].mxu0 %v954_v33 }
  0x7e   : > { %606 = vmatmul.mubr.bf16.vlgmr.msra.gmra.mrb[0].mxu1 %v957_v35 }
 0x150   : > { %v819_v37 = vpop.f32.mrb[0].mxu0 }
 0x151   : > { %v841_v38 = vpop.f32.mrb[0].mxu1  ;;  %v820_v39 = vpop.f32.mrb[1].mxu0 }
 0x152   : > { %v821_v40 = vadd.f32 %v820_v39, %v819_v37  ;;  %v842_v41 = vpop.f32.mrb[1].mxu1  ;;  %v822_v42 = vpop.f32.mrb[2].mxu0 }
 0x153   : > { %v843_v43 = vadd.f32 %v842_v41, %v841_v38  ;;  %v844_v44 = vpop.f32.mrb[2].mxu1  ;;  %v823_v45 = vpop.f32.mrb[3].mxu0 }
 0x154   : > { %v824_v47 = vadd.f32 %v823_v45, %v822_v42  ;;  %v845_v48 = vpop.f32.mrb[3].mxu1 }
 0x155   : > { %v608_v49 = vadd.f32 %v843_v43, %v821_v40  ;;  %v846_v50 = vadd.f32 %v845_v48, %v844_v44  ;;  %621 = sbr.rel (%p795_p12) target bundleno = 519 (0x207), region = 48 }
 0x157   : > { %v614_v52 = vadd.f32 %v608_v49, %v250_v46  ;;  %v611_v53 = vadd.f32 %v846_v50, %v824_v47 }
 0x159   : > { %616 = vst [vmem:[#allocation2] sm:$0xff] %v614_v52  ;;  %v615_v54 = vadd.f32 %v611_v53, %v251_v51 }
 0x15b   : > { %617 = vst [vmem:[#allocation2 + $0x8] sm:$0xff] %v615_v54 }
 0x160   : > { %v622_v55 = vld [vmem:[#allocation2] sm:$0xff] }
 0x161   : > { %v631_v58 = vadd.f32 %v796_v56, %v622_v55 }
 0x162   : > { %v623_v57 = vld [vmem:[#allocation2 + $0x8] sm:$0xff] }
 0x163   : > { %v632_v59 = vadd.f32 %v796_v56, %v623_v57  ;;  %v633_v60 = vmul.f32 %v631_v58, %v631_v58 }
 0x165   : > { %635 = vadd.xlane.f32.xlu0 %v633_v60  ;;  %v634_v61 = vmul.f32 %v632_v59, %v632_v59 }
 0x169   : > { %637 = vadd.xlane.f32.xlu0 %v634_v61 }
 0x1f2   : > { %v636_v62 = vpop.xlane.xlu0 %635 }
 0x1f3   : > { %v639_v63 = vadd.f32 1e-05, %v636_v62 }
 0x1f5   : > { %960 = vrsqrt.f32 %v639_v63 }
 0x1f6   : > { %v638_v0 = vpop.xlane.xlu0 %637 }
 0x1f7   : > { %v640_v1 = vadd.f32 1e-05, %v638_v0 }
 0x1f9   : > { %962 = vrsqrt.f32 %v640_v1 }
 0x1ff   : > { %v961_v2 = vpop.eup %960 }
 0x200   : > { %v643_v3 = vmul.f32 %v961_v2, %v631_v58 }
 0x202   : > { %645 = vst [vmem:[#allocation8] sm:$0xff] %v643_v3 }
 0x203   : > { %v963_v4 = vpop.eup %962 }
 0x204   : > { %v644_v5 = vmul.f32 %v963_v4, %v632_v59 }
 0x206   : > { %646 = vst [vmem:[#allocation8 + $0x8] sm:$0xff] %v644_v5 }
 0x207 PF: > { %p1341_p4 = scmp.eq.s32.totalorder %s746_s18, 1  ;;  %s1118_s20 = smov [#allocation8]  }
 0x208   : > { %s656_s22 = sshll.u32 %s1118_s20, 4  ;;  %s657_s22 = int_to_ptr.vmem [resolvable:$true] %s656_s22 }
 0x209   : > { %s1024_s30 = scalar_lea.vmem %s657_s22, 256  ;;  %p1031_p0 = scmp.lt.s32.totalorder %s657_s22, %s657_s22 }
 0x20a   : > { %p1025_p8 = scmp.ne.s32.totalorder %s657_s22, %s1024_s30  ;;  %p1032_p10 = scmp.lt.s32.totalorder %s1024_s30, %s1024_s30 }
 0x20c   : > { %p1026_p2 = pnand %p1025_p8, %p1341_p4  ;;  %p1033_p5 = por %p1032_p10, %p1031_p0 }
 0x20e   : > { %p1027_p3 = pneg %p1026_p2 }
 0x210   : > { %p1034_p6 = pnand %p1033_p5, %p1027_p3 }
 0x212   : > { %1037 = shalt.err (!%p1034_p6)
}
 0x213   : > { %s1038_s18 = scalar_lea.hbm %s1388_s3, 256 }
 0x214   : > { %p1039_p11 = scmp.ne.s32.totalorder %s1388_s3, %s1038_s18  ;;  %p1044_p7 = scmp.lt.u32.totalorder %s1038_s18, %s1388_s3 }
 0x216   : > { %p1040_p13 = pnand %p1039_p11, %p1341_p4 }
 0x218   : > { %p1041_p1 = pneg %p1040_p13 }
 0x21a   : > { %p1046_p9 = pnand %p1044_p7, %p1041_p1 }
 0x21c   : > { %1049 = shalt.err (!%p1046_p9)
}
 0x21d   : > { %s1119_s21 = smov 128   ;;  %s1120_s5 = smov 8  }
 0x21e   : > { %852 = dma.vmem_to_hbm [thread:$0]  (%p1341_p4), %s657_s22, 256, %s1388_s3, [#allocation5], %s1119_s21, %s1119_s21, %s1120_s5  }
 0x21f   : > { %1083 = dma.done.wait (%p1341_p4), [#allocation5], 256  }
 0x220   : > { %1085 = vsyncadd (%p1341_p4), [#allocation5], 4294967040 }
 0x221 PF: > { %s20_s17 = sadd.s32 1, %s1108_s17   ;;  %s1397_s12 = smov %s1092_s13 }
 0x222   : > { %p17_p12 = scmp.ge.s32.totalorder %s20_s17, 4   ;;  %s1398_s13 = smov %s1096_s14 }
 0x223   : > { %s1399_s14 = smov %s1192_s24  ;;  %s1400_s15 = smov %s1104_s16 }
 0x224   : > { %s1401_s16 = smov %s1403_s19  ;;  %19 = sbr.rel (!%p17_p12) target bundleno = 7 (0x7), region = 91 }
 0x22b   :  { %672 = vsyncpa [#allocation4], 1 }
 0x22c   :  { %674 = vsyncpa [#allocation4 + $0x1], 1 }
 0x22d   :  { %675 = vsyncpa [#allocation7], 1 }
 0x22e   :  { %677 = vsyncpa [#allocation7 + $0x1], 1 }
 0x22f   :  { %678 = vsyncpa [#allocation5], 1 }
 0x230   :  { %680 = vsyncpa [#allocation5 + $0x1], 1 }

</bundles_post_ra>
